<compile_context>
chip_gen: v7x
topology: tpu7x:2x2x1
jax: 0.10.0
libtpu: 0.0.40
codegen_flags: <defaults>
</compile_context>

<pallas_src>
import jax
import jax.numpy as jnp
import numpy as np
from jax.experimental import pallas as pl
from jax.experimental.pallas import tpu as pltpu

POOL_K = 3  # nn.AvgPool2d(kernel_size=3): stride=3, padding=0, floor mode


def _cse_kernel(x_ref, pool_ref, w1_ref, b1_ref, w2_ref, b2_ref, o_ref):
    """cSE forward for one batch element (one grid step), fully on-chip.

    x_ref    : (Nt, C)   channel-last tokens (lane-dense along C)
    pool_ref : (Np, Nt)  avg-pool matrix (entries 1/9), shared across batch
    w1_ref   : (C, Cm)   conv1 1x1 weight, pre-transposed (in, out)
    b1_ref   : (1, Cm)
    w2_ref   : (Cm, C)   conv2 1x1 weight, pre-transposed (in, out)
    b2_ref   : (1, C)
    o_ref    : (Np, C)
    """
    x = x_ref[...].astype(jnp.float32)

    # AvgPool2d(3) as an MXU matmul against the banded pooling matrix.
    pooled = jnp.dot(pool_ref[...], x, preferred_element_type=jnp.float32)

    # Conv2d(C -> C//r, kernel_size=1) + ReLU.
    h = jnp.dot(pooled, w1_ref[...], preferred_element_type=jnp.float32)
    h = jnp.maximum(h + b1_ref[...], 0.0)

    # Conv2d(C//r -> C, kernel_size=1).
    out = jnp.dot(h, w2_ref[...], preferred_element_type=jnp.float32) + b2_ref[...]

    o_ref[...] = out.astype(o_ref.dtype)


def _build_pool_matrix(h, w):
    """(Ho*Wo, H*W) matrix realizing AvgPool2d(kernel_size=3) (floor mode)."""
    ho, wo = h // POOL_K, w // POOL_K
    p = np.zeros((ho * wo, h * w), np.float32)
    inv = 1.0 / float(POOL_K * POOL_K)
    for ph in range(ho):
        for pw in range(wo):
            row = ph * wo + pw
            for i in range(POOL_K):
                for j in range(POOL_K):
                    col = (POOL_K * ph + i) * w + (POOL_K * pw + j)
                    p[row, col] = inv
    return jnp.asarray(p)


def cse_forward(x, params):
    """cSEModule.forward on a channel-first (B, C, H, W) input."""
    B, C, H, W = x.shape
    Ho, Wo = H // POOL_K, W // POOL_K
    Nt, Np = H * W, Ho * Wo
    Cm = params["w1"].shape[1]

    # Channel-last tokens: lanes = C (dense), sublanes = flattened (H, W).
    x_tok = jnp.transpose(x, (0, 2, 3, 1)).reshape(B, Nt, C)
    pool = _build_pool_matrix(H, W)                              # (Np, Nt)

    out_tok = pl.pallas_call(
        _cse_kernel,
        out_shape=jax.ShapeDtypeStruct((B, Np, C), x.dtype),
        grid_spec=pltpu.PrefetchScalarGridSpec(
            num_scalar_prefetch=0,
            grid=(B,),
            in_specs=[
                pl.BlockSpec((None, Nt, C), lambda b: (b, 0, 0)),   # per-batch x
                pl.BlockSpec((Np, Nt), lambda b: (0, 0)),           # shared pool
                pl.BlockSpec((C, Cm), lambda b: (0, 0)),            # shared W1
                pl.BlockSpec((1, Cm), lambda b: (0, 0)),            # shared b1
                pl.BlockSpec((Cm, C), lambda b: (0, 0)),            # shared W2
                pl.BlockSpec((1, C), lambda b: (0, 0)),             # shared b2
            ],
            out_specs=pl.BlockSpec((None, Np, C), lambda b: (b, 0, 0)),
        ),
        compiler_params=pltpu.CompilerParams(
            dimension_semantics=("parallel",)),
    )(x_tok, pool, params["w1"], params["b1"], params["w2"], params["b2"])

    return out_tok.reshape(B, Ho, Wo, C).transpose(0, 3, 1, 2)   # (B, C, Ho, Wo)


def init_params(key, in_channels, reduction):
    """Deterministic synthetic parameters matching the module's shapes."""
    cm = in_channels // reduction
    k1, k2, k3, k4 = jax.random.split(key, 4)
    # torch Conv2d 1x1 weights are (out, in, 1, 1); stored pre-transposed (in, out).
    w1 = 0.05 * jax.random.normal(k1, (in_channels, cm), jnp.float32)
    b1 = 0.10 * jax.random.normal(k2, (1, cm), jnp.float32)
    w2 = 0.05 * jax.random.normal(k3, (cm, in_channels), jnp.float32)
    b2 = 0.10 * jax.random.normal(k4, (1, in_channels), jnp.float32)
    return dict(w1=w1, b1=b1, w2=w2, b2=b2)


# ---------------- pure-JAX reference (for correctness check) ----------------
def _ref_cse(x, params):
    B, C, H, W = x.shape
    Ho, Wo = H // POOL_K, W // POOL_K
    xc = x[:, :, :Ho * POOL_K, :Wo * POOL_K]                      # floor mode
    pooled = xc.reshape(B, C, Ho, POOL_K, Wo, POOL_K).mean(axis=(3, 5))
    h = jnp.einsum('bchw,cd->bdhw', pooled, params["w1"],
                   precision=jax.lax.Precision.HIGHEST)
    h = jnp.maximum(h + params["b1"].reshape(1, -1, 1, 1), 0.0)
    out = jnp.einsum('bdhw,dc->bchw', h, params["w2"],
                     precision=jax.lax.Precision.HIGHEST)
    return out + params["b2"].reshape(1, -1, 1, 1)


if __name__ == "__main__":
    key = jax.random.PRNGKey(0)
    B, C, H, W = 2, 128, 12, 12      # in_channels=128, reduction=4
    reduction = 4
    kx, kp = jax.random.split(key)
    x = jax.random.normal(kx, (B, C, H, W), jnp.float32)
    params = init_params(kp, C, reduction)

    out = cse_forward(x, params)
    out = jax.block_until_ready(out)

    ref = _ref_cse(x, params)
    assert out.shape == (B, C, H // POOL_K, W // POOL_K)
    if not jnp.allclose(out, ref, atol=1e-4, rtol=1e-4):
        raise RuntimeError("Pallas output mismatches JAX reference")
    print("KERNEL_OK")
</pallas_src>

<mosaic_0001>
module attributes {stable_mosaic.version = 11 : i64} {
  func.func @_cse_kernel(%arg0: i32, %arg1: memref<1x144x128xf32, #tpu.memory_space<vmem>>, %arg2: memref<16x144xf32, #tpu.memory_space<vmem>>, %arg3: memref<128x32xf32, #tpu.memory_space<vmem>>, %arg4: memref<1x32xf32, #tpu.memory_space<vmem>>, %arg5: memref<32x128xf32, #tpu.memory_space<vmem>>, %arg6: memref<1x128xf32, #tpu.memory_space<vmem>>, %arg7: memref<1x16x128xf32, #tpu.memory_space<vmem>>) attributes {dimension_semantics = [#tpu.dimension_semantics<parallel>], iteration_bounds = array<i64: 2>, scalar_prefetch = 0 : i64, scratch_operands = 0 : i64, tpu.core_type = #tpu.core_type<tc>, window_params = [{transform_indices = @transform_0, window_bounds = array<i64: 1, 144, 128>}, {pipeline_mode = #tpu.pipeline_mode<synchronous>, transform_indices = @transform_1, window_bounds = array<i64: 16, 144>}, {pipeline_mode = #tpu.pipeline_mode<synchronous>, transform_indices = @transform_2, window_bounds = array<i64: 128, 32>}, {pipeline_mode = #tpu.pipeline_mode<synchronous>, transform_indices = @transform_3, window_bounds = array<i64: 1, 32>}, {pipeline_mode = #tpu.pipeline_mode<synchronous>, transform_indices = @transform_4, window_bounds = array<i64: 32, 128>}, {pipeline_mode = #tpu.pipeline_mode<synchronous>, transform_indices = @transform_5, window_bounds = array<i64: 1, 128>}, {transform_indices = @transform_6, window_bounds = array<i64: 1, 16, 128>}]} {
    %c0 = arith.constant 0 : index
    %c0_0 = arith.constant 0 : index
    %c0_1 = arith.constant 0 : index
    %0 = vector.load %arg1[%c0, %c0_0, %c0_1] : memref<1x144x128xf32, #tpu.memory_space<vmem>>, vector<1x144x128xf32>
    %1 = vector.shape_cast %0 : vector<1x144x128xf32> to vector<144x128xf32>
    %c0_2 = arith.constant 0 : index
    %c0_3 = arith.constant 0 : index
    %2 = vector.load %arg2[%c0_2, %c0_3] : memref<16x144xf32, #tpu.memory_space<vmem>>, vector<16x144xf32>
    %cst = arith.constant dense<0.000000e+00> : vector<16x128xf32>
    %3 = tpu.matmul %2, %1, %cst {dimension_numbers = #tpu.dot_dimension_numbers<[1], [0], [0], [1], [0, 0, 1, 1], [], []>} : vector<16x144xf32>, vector<144x128xf32>, vector<16x128xf32> -> vector<16x128xf32>
    %c0_4 = arith.constant 0 : index
    %c0_5 = arith.constant 0 : index
    %4 = vector.load %arg3[%c0_4, %c0_5] : memref<128x32xf32, #tpu.memory_space<vmem>>, vector<128x32xf32>
    %cst_6 = arith.constant dense<0.000000e+00> : vector<16x32xf32>
    %5 = tpu.matmul %3, %4, %cst_6 {dimension_numbers = #tpu.dot_dimension_numbers<[1], [0], [0], [1], [0, 0, 1, 1], [], []>} : vector<16x128xf32>, vector<128x32xf32>, vector<16x32xf32> -> vector<16x32xf32>
    %c0_7 = arith.constant 0 : index
    %c0_8 = arith.constant 0 : index
    %6 = vector.load %arg4[%c0_7, %c0_8] : memref<1x32xf32, #tpu.memory_space<vmem>>, vector<1x32xf32>
    %7 = vector.broadcast %6 : vector<1x32xf32> to vector<16x32xf32>
    %8 = arith.addf %5, %7 : vector<16x32xf32>
    %cst_9 = arith.constant 0.000000e+00 : f32
    %9 = vector.broadcast %cst_9 : f32 to vector<16x32xf32>
    %10 = arith.maximumf %8, %9 : vector<16x32xf32>
    %c0_10 = arith.constant 0 : index
    %c0_11 = arith.constant 0 : index
    %11 = vector.load %arg5[%c0_10, %c0_11] : memref<32x128xf32, #tpu.memory_space<vmem>>, vector<32x128xf32>
    %cst_12 = arith.constant dense<0.000000e+00> : vector<16x128xf32>
    %12 = tpu.matmul %10, %11, %cst_12 {dimension_numbers = #tpu.dot_dimension_numbers<[1], [0], [0], [1], [0, 0, 1, 1], [], []>} : vector<16x32xf32>, vector<32x128xf32>, vector<16x128xf32> -> vector<16x128xf32>
    %c0_13 = arith.constant 0 : index
    %c0_14 = arith.constant 0 : index
    %13 = vector.load %arg6[%c0_13, %c0_14] : memref<1x128xf32, #tpu.memory_space<vmem>>, vector<1x128xf32>
    %14 = vector.broadcast %13 : vector<1x128xf32> to vector<16x128xf32>
    %15 = arith.addf %12, %14 : vector<16x128xf32>
    %c0_15 = arith.constant 0 : index
    %c0_16 = arith.constant 0 : index
    %c0_17 = arith.constant 0 : index
    %16 = vector.load %arg7[%c0_15, %c0_16, %c0_17] : memref<1x16x128xf32, #tpu.memory_space<vmem>>, vector<1x16x128xf32>
    %17 = vector.shape_cast %16 : vector<1x16x128xf32> to vector<16x128xf32>
    %18 = vector.shape_cast %15 : vector<16x128xf32> to vector<1x16x128xf32>
    tpu.vector_store %arg7[%c0_15, %c0_16, %c0_17], %18 {strides = array<i32>} : memref<1x16x128xf32, #tpu.memory_space<vmem>>, vector<1x16x128xf32>,
    return
  }
  func.func @transform_0(%arg0: i32) -> (i32, i32, i32) {
    %c0_i32 = arith.constant 0 : i32
    %c0_i32_0 = arith.constant 0 : i32
    %c0_i32_1 = arith.constant 0 : i32
    return %arg0, %c0_i32, %c0_i32_0 : i32, i32, i32
  }
  func.func @transform_1(%arg0: i32) -> (i32, i32) {
    %c0_i32 = arith.constant 0 : i32
    %c0_i32_0 = arith.constant 0 : i32
    %c0_i32_1 = arith.constant 0 : i32
    return %c0_i32, %c0_i32_0 : i32, i32
  }
  func.func @transform_2(%arg0: i32) -> (i32, i32) {
    %c0_i32 = arith.constant 0 : i32
    %c0_i32_0 = arith.constant 0 : i32
    %c0_i32_1 = arith.constant 0 : i32
    return %c0_i32, %c0_i32_0 : i32, i32
  }
  func.func @transform_3(%arg0: i32) -> (i32, i32) {
    %c0_i32 = arith.constant 0 : i32
    %c0_i32_0 = arith.constant 0 : i32
    %c0_i32_1 = arith.constant 0 : i32
    return %c0_i32, %c0_i32_0 : i32, i32
  }
  func.func @transform_4(%arg0: i32) -> (i32, i32) {
    %c0_i32 = arith.constant 0 : i32
    %c0_i32_0 = arith.constant 0 : i32
    %c0_i32_1 = arith.constant 0 : i32
    return %c0_i32, %c0_i32_0 : i32, i32
  }
  func.func @transform_5(%arg0: i32) -> (i32, i32) {
    %c0_i32 = arith.constant 0 : i32
    %c0_i32_0 = arith.constant 0 : i32
    %c0_i32_1 = arith.constant 0 : i32
    return %c0_i32, %c0_i32_0 : i32, i32
  }
  func.func @transform_6(%arg0: i32) -> (i32, i32, i32) {
    %c0_i32 = arith.constant 0 : i32
    %c0_i32_0 = arith.constant 0 : i32
    %c0_i32_1 = arith.constant 0 : i32
    return %arg0, %c0_i32, %c0_i32_0 : i32, i32, i32
  }
}

</mosaic_0001>

<bundles_post_ra>
// kernel: tpu_custom_call.1
= control target key start
LH: loop header
LB: loop body
LE: loop exit
PB: predicated region body
PF: predicated region fallthrough
CT: control target
= control target key end

     0   :  { %11 = vsyncpa [#allocation3], 0  ;;  %s1271_s0 = inlined_call_operand.hbm [shape: f32[2,144,128], index: 0, kind: input, shape index: {}]   ;;  %s1272_s1 = inlined_call_operand.vmem [shape: f32[16,144], index: 1, kind: input, shape index: {}]   ;;  %s1273_s2 = inlined_call_operand.vmem [shape: f32[128,32], index: 2, kind: input, shape index: {}]   ;;  %s1274_s3 = inlined_call_operand.vmem [shape: f32[1,32], index: 3, kind: input, shape index: {}]   ;;  %s1275_s4 = inlined_call_operand.vmem [shape: f32[32,128], index: 4, kind: input, shape index: {}]   ;;  %s1276_s5 = inlined_call_operand.vmem [shape: f32[1,128], index: 5, kind: input, shape index: {}]   ;;  %s1277_s6 = inlined_call_operand.hbm [shape: f32[2,16,128], index: 6, kind: output, shape index: {}]  }
   0x1   :  { %13 = vsyncpa [#allocation3 + $0x1], 0 }
   0x2   :  { %14 = vsyncpa [#allocation4], 0 }
   0x3   :  { %16 = vsyncpa [#allocation4 + $0x1], 0  ;;  %s1005_s21 = smov 0   ;;  %s1007_s22 = smov 0  }
   0x4   :  { %s1009_s23 = smov 0   ;;  %s1011_s24 = smov 0  }
   0x5 LB: > { %s1026_s25 = sadd.s32 4294967295, %s961_s24   ;;  %s656_s26 = sadd.s32 4294967294, %s961_s24   ;;  %s961_s24 = sphi %s1011_s24, %s1289_s24   ;;  %s957_s23 = sphi %s1009_s23, %s1288_s23   ;;  %s953_s22 = sphi %s1007_s22, %s1287_s22   ;;  %s949_s21 = sphi %s1005_s21, %s1286_s21  }
   0x6   : > { %s1030_s27 = sadd.s32 1, %s961_s24   ;;  %s29_s28 = sadd.s32 1, %s957_s23 }
   0x7   : > { %s26_s29 = ssub.s32 %s961_s24, %s1030_s27  ;;  %p36_p0 = scmp.ne.s32.totalorder %s957_s23, %s953_s22 }
   0x8   : > { %p27_p1 = scmp.eq.s32.totalorder %s26_s29, 0  ;;  %p37_p2 = scmp.eq.s32.totalorder %s961_s24, 0 }
   0x9   : > { %p42_p3 = scmp.ne.s32.totalorder %s953_s22, %s949_s21  ;;  %p43_p4 = scmp.eq.s32.totalorder %s1026_s25, 0 }
   0xa   : > { %s1042_s30 = scalar_select %p27_p1, %s957_s23, %s29_s28  }
   0xb   : > { %p38_p5 = por %p37_p2, %p36_p0  ;;  %p1044_p6 = por %p43_p4, %p42_p3 }
   0xc   : > { %p171_p7 = scmp.eq.s32.totalorder %s1026_s25, 1  ;;  %p177_p8 = scmp.eq.s32.totalorder %s656_s26, 1 }
   0xd   : > { %p826_p10 = scmp.lt.s32.totalorder %s961_s24, 2  ;;  %s212_s10 = sand.u32 1, %s957_s23  }
   0xe   : > { %p1051_p11 = por %p171_p7, %p36_p0  ;;  %p1055_p12 = por %p177_p8, %p42_p3 }
   0xf   : > { %s812_s11 = smul.u32 2304, %s961_s24  ;;  %p1066_p13 = pnand %p826_p10, %p38_p5 }
  0x10   : > { %s1280_s8 = scalar_select %p1051_p11, 1, 0 }
  0x11   : > { %s1281_s9 = scalar_select %p1055_p12, 1, 0 }
  0x12   : > { %s811_s12 = smul.u32 144, %s212_s10  ;;  %s1064_s15 = scalar_lea.hbm %s1271_s0, %s812_s11 }
  0x13   : > { %s1072_s19 = scalar_lea.sflag [#allocation3], %s212_s10  ;;  %s865_s20 = scalar_lea.hbm %s1064_s15, 2304 }
  0x14   : > { %s216_s17 = scalar_lea.vmem [#allocation2], %s811_s12  ;;  %p866_p0 = scmp.ne.s32.totalorder %s1064_s15, %s865_s20 }
  0x15   : > { %s223_s18 = sshll.u32 %s216_s17, 4  ;;  %p867_p1 = pneg %p1066_p13  ;;  %s1070_s18 = int_to_ptr.vmem [resolvable:$true] %s223_s18 }
  0x16   : > { %s870_s29 = scalar_lea.hbm %s1271_s0, 4608  ;;  %p871_p4 = scmp.lt.u32.totalorder %s1064_s15, %s1271_s0 }
  0x17   : > { %p868_p2 = pnand %p867_p1, %p866_p0  ;;  %p872_p5 = scmp.lt.u32.totalorder %s870_s29, %s865_s20 }
  0x18   : > { %p874_p8 = scmp.lt.u32.totalorder %s865_s20, %s1064_s15 }
  0x19   : > { %p869_p3 = pneg %p868_p2  ;;  %p873_p7 = por %p872_p5, %p871_p4 }
  0x1b   : > { %p875_p10 = por %p874_p8, %p873_p7 }
  0x1d   : > { %p876_p9 = pnand %p875_p10, %p869_p3 }
  0x1f   : > { %879 = shalt.err (!%p876_p9)
}
  0x20   : > { %s880_s10 = scalar_lea.vmem %s1070_s18, 2304  ;;  %s963_s12 = smov [#allocation2]  }
  0x21   : > { %p881_p0 = scmp.ne.s32.totalorder %s1070_s18, %s880_s10  ;;  %s885_s14 = sshll.u32 %s963_s12, 4  ;;  %s886_s14 = int_to_ptr.vmem [resolvable:$false] %s885_s14 }
  0x22   : > { %s887_s17 = scalar_lea.vmem %s886_s14, 4608  ;;  %p888_p11 = scmp.lt.s32.totalorder %s1070_s18, %s886_s14 }
  0x23   : > { %p883_p2 = pnand %p881_p0, %p867_p1  ;;  %p889_p4 = scmp.lt.s32.totalorder %s887_s17, %s880_s10 }
  0x25   : > { %p884_p12 = pneg %p883_p2  ;;  %p890_p5 = por %p889_p4, %p888_p11 }
  0x27   : > { %p891_p7 = pnand %p890_p5, %p884_p12 }
  0x29   : > { %894 = shalt.err (!%p891_p7)
}
  0x2a   : > { %s964_s20 = smov 128   ;;  %s965_s26 = smov 8  }
  0x2b   : > { %821 = dma.hbm_to_vmem [thread:$0]  (!%p1066_p13), %s1064_s15, 2304, %s1070_s18, %s1072_s19, %s964_s20, %s964_s20, %s965_s26  }
  0x2c   : > { %p660_p9 = scmp.ge.s32.totalorder %s961_s24, 1  ;;  %p231_p1 = scmp.lt.s32.totalorder %s961_s24, 3 }
  0x2e   : > { %p232_p3 = pnand %p660_p9, %p231_p1 }
  0x2f   : > { %s1103_s28 = sand.u32 (!%p232_p3), 1, %s953_s22  }
  0x30   : > { %235 = sbr.rel (%p232_p3) target bundleno = 758 (0x2f6), region = 44  ;;  %s238_s11 = scalar_lea.sflag (!%p232_p3), [#allocation3], %s1103_s28 }
  0x31   : > { %s813_s29 = smul.u32 (!%p232_p3), 144, %s1103_s28 }
  0x33   : > { %s1107_s13 = scalar_lea.vmem (!%p232_p3), [#allocation2], %s813_s29 }
  0x37   : > { %940 = dma.done.wait (%p1044_p6), %s238_s11, 2304  }
  0x38   : > { %942 = vsyncadd (%p1044_p6), %s238_s11, 4294964992  ;;  %v966_v0 = vmov 0.0|0.0   ;;  %v270_v1 = vld [vmem:[%s1107_s13] sm:$0xff]  ;;  %v271_v2 = vld [vmem:[%s1107_s13 + $0x8] sm:$0xff]  ;;  %vm292_vm0 = vcmask 130048   ;;  %vm485_vm1 = vcmask 261120  }
  0x39   : > { %744 = vmatprep.subr.bf16.mxu0 %v966_v0  ;;  %v272_v3 = vld [vmem:[%s1107_s13 + $0x10] sm:$0xff]  ;;  %v745_v4 = vpack.c.bf16 %v271_v2, %v270_v1  ;;  %v273_v5 = vld [vmem:[%s1107_s13 + $0x18] sm:$0xff]  ;;  %v274_v7 = vld [vmem:[%s1107_s13 + $0x20] sm:$0xff]  ;;  %s661_s20 = sshll.u32 %s1103_s28, 4  ;;  %s673_s15 = sshll.u32 %s1026_s25, 8 }
  0x3a   : > { %v748_v6 = vpack.c.bf16 %v273_v5, %v272_v3  ;;  %v275_v8 = vld [vmem:[%s1107_s13 + $0x28] sm:$0xff]  ;;  %v276_v11 = vld [vmem:[%s1107_s13 + $0x30] sm:$0xff]  ;;  %v277_v14 = vld [vmem:[%s1107_s13 + $0x38] sm:$0xff]  ;;  %s269_s26 = scalar_lea.vmem [#allocation5], %s661_s20  ;;  %s1227_s19 = scalar_lea.hbm %s1277_s6, %s673_s15 }
  0x3b   : > { %746 = vmatpush1.bf16.msra.mxu0 %v745_v4  ;;  %v289_v9 = vld [vmem:[%s1272_s1 + $0x8] sm:$0xff]  ;;  %v751_v10 = vpack.c.bf16 %v275_v8, %v274_v7  ;;  %v374_v12 = vld [vmem:[%s1273_s2] sm:$0xff]  ;;  %v376_v16 = vld [vmem:[%s1273_s2 + $0x10] sm:$0xff]  ;;  %v754_v21 = vpack.c.bf16 %v277_v14, %v276_v11  ;;  %s583_s29 = sshll.u32 %s269_s26, 4  ;;  %s570_s10 = scalar_lea.sflag [#allocation4], %s1103_s28  ;;  %s1222_s29 = int_to_ptr.vmem [resolvable:$true] %s583_s29 }
  0x3c   : > { %747 = vmatprep.subr.bf16.mxu0 %v966_v0  ;;  %662 = vmatprep.mubr.msk.f32.mxu0 %vm292_vm0, %v289_v9  ;;  %v375_v13 = vld [vmem:[%s1273_s2 + $0x8] sm:$0xff]  ;;  %v377_v17 = vld [vmem:[%s1273_s2 + $0x18] sm:$0xff]  ;;  %v378_v19 = vld [vmem:[%s1273_s2 + $0x20] sm:$0xff]  ;;  %s895_s12 = scalar_lea.vmem %s1222_s29, 256  ;;  %p1283_p11 = scmp.ne.s32.totalorder %s1280_s8, 0 }
  0x3d   : > { %v771_v15 = vpack.c.bf16 %v375_v13, %v374_v12  ;;  %v775_v18 = vpack.c.bf16 %v377_v17, %v376_v16  ;;  %v379_v20 = vld [vmem:[%s1273_s2 + $0x28] sm:$0xff]  ;;  %v278_v22 = vld [vmem:[%s1107_s13 + $0x40] sm:$0xff]  ;;  %v381_v26 = vld [vmem:[%s1273_s2 + $0x38] sm:$0xff]  ;;  %p896_p6 = scmp.ne.s32.totalorder %s1222_s29, %s895_s12  ;;  %s967_s25 = smov [#allocation5]  }
  0x3e   : > { %v279_v23 = vld [vmem:[%s1107_s13 + $0x48] sm:$0xff]  ;;  %v779_v24 = vpack.c.bf16 %v379_v20, %v378_v19  ;;  %v380_v25 = vld [vmem:[%s1273_s2 + $0x30] sm:$0xff]  ;;  %v281_v29 = vld [vmem:[%s1107_s13 + $0x58] sm:$0xff]  ;;  %s899_s14 = sshll.u32 %s967_s25, 4  ;;  %s900_s14 = int_to_ptr.vmem [resolvable:$false] %s899_s14 }
  0x3f   : > { %749 = vmatpush1.bf16.msra.mxu0 %v748_v6  ;;  %772 = vmatprep.subr.bf16.mxu1 %v771_v15  ;;  %v757_v27 = vpack.c.bf16 %v279_v23, %v278_v22  ;;  %v280_v28 = vld [vmem:[%s1107_s13 + $0x50] sm:$0xff]  ;;  %v783_v30 = vpack.c.bf16 %v381_v26, %v380_v25  ;;  %v383_v32 = vld [vmem:[%s1273_s2 + $0x48] sm:$0xff]  ;;  %v282_v34 = vld [vmem:[%s1107_s13 + $0x60] sm:$0xff]  ;;  %p897_p12 = pnand %p896_p6, %p1283_p11  ;;  %p902_p8 = scmp.lt.s32.totalorder %s1222_s29, %s900_s14 }
  0x40   : > { %750 = vmatprep.subr.bf16.mxu0 %v966_v0  ;;  %774 = vmatpush3.bf16.msra.mxu1 %v771_v15  ;;  %v382_v31 = vld [vmem:[%s1273_s2 + $0x40] sm:$0xff]  ;;  %v760_v33 = vpack.c.bf16 %v281_v29, %v280_v28  ;;  %v283_v35 = vld [vmem:[%s1107_s13 + $0x68] sm:$0xff]  ;;  %v384_v37 = vld [vmem:[%s1273_s2 + $0x50] sm:$0xff] }
  0x41   : > { %776 = vmatprep.subr.bf16.mxu1 %v775_v18  ;;  %v787_v36 = vpack.c.bf16 %v383_v32, %v382_v31  ;;  %v385_v38 = vld [vmem:[%s1273_s2 + $0x58] sm:$0xff]  ;;  %v763_v39 = vpack.c.bf16 %v283_v35, %v282_v34  ;;  %v284_v40 = vld [vmem:[%s1107_s13 + $0x70] sm:$0xff]  ;;  %v387_v44 = vld [vmem:[%s1273_s2 + $0x68] sm:$0xff]  ;;  %p898_p13 = pneg %p897_p12 }
  0x42   : > { %v285_v41 = vld [vmem:[%s1107_s13 + $0x78] sm:$0xff]  ;;  %v791_v42 = vpack.c.bf16 %v385_v38, %v384_v37  ;;  %v386_v43 = vld [vmem:[%s1273_s2 + $0x60] sm:$0xff]  ;;  %v287_v47 = vld [vmem:[%s1107_s13 + $0x88] sm:$0xff] }
  0x43   : > { %752 = vmatpush1.bf16.msra.mxu0 %v751_v10  ;;  %v766_v45 = vpack.c.bf16 %v285_v41, %v284_v40  ;;  %v286_v46 = vld [vmem:[%s1107_s13 + $0x80] sm:$0xff]  ;;  %v795_v48 = vpack.c.bf16 %v387_v44, %v386_v43  ;;  %v291_v51 = vld [vmem:[%s1272_s1 + $0x18] sm:$0xff]  ;;  %v475_v57 = vld [vmem:[%s1275_s4 + $0x8] sm:$0xff]  ;;  %s901_s13 = scalar_lea.vmem %s900_s14, 512 }
  0x44   : > { %753 = vmatprep.subr.bf16.mxu0 %v966_v0  ;;  %778 = vmatpush3.bf16.msra.mxu1 %v775_v18  ;;  %v769_v49 = vpack.c.bf16 %v287_v47, %v286_v46  ;;  %v288_v50 = vld [vmem:[%s1272_s1] sm:$0xff]  ;;  %v290_v52 = vld [vmem:[%s1272_s1 + $0x10] sm:$0xff]  ;;  %v389_v54 = vld [vmem:[%s1273_s2 + $0x78] sm:$0xff]  ;;  %p903_p10 = scmp.lt.s32.totalorder %s901_s13, %s895_s12 }
  0x45   : > { %780 = vmatprep.subr.bf16.mxu1 %v779_v24  ;;  %v388_v53 = vld [vmem:[%s1273_s2 + $0x70] sm:$0xff]  ;;  %v474_v56 = vld [vmem:[%s1275_s4] sm:$0xff] }
  0x46   : > { %v799_v55 = vpack.c.bf16 %v389_v54, %v388_v53  ;;  %v803_v58 = vpack.c.bf16 %v475_v57, %v474_v56  ;;  %v476_v63 = vld [vmem:[%s1275_s4 + $0x10] sm:$0xff]  ;;  %v664_v2 = vld [vmem:[%s1274_s3] ss:$0 sm:$0xff]  ;;  %p904_p0 = por %p903_p10, %p902_p8 }
  0x47   : > { %755 = vmatpush1.bf16.msra.mxu0 %v754_v21  ;;  %v665_v9 = vld [vmem:[%s1276_s5] ss:$0 sm:$0xff] }
  0x48   : > { %756 = vmatprep.subr.bf16.mxu0 %v966_v0  ;;  %782 = vmatpush3.bf16.msra.mxu1 %v779_v24  ;;  %p905_p2 = pnand %p904_p0, %p898_p13 }
  0x49   : > { %784 = vmatprep.subr.bf16.mxu1 %v783_v30 }
  0x4b   : > { %758 = vmatpush1.bf16.msra.mxu0 %v757_v27 }
  0x4c   : > { %759 = vmatprep.subr.bf16.mxu0 %v966_v0  ;;  %786 = vmatpush3.bf16.msra.mxu1 %v783_v30 }
  0x4d   : > { %788 = vmatprep.subr.bf16.mxu1 %v787_v36 }
  0x4f   : > { %761 = vmatpush1.bf16.msra.mxu0 %v760_v33 }
  0x50   : > { %762 = vmatprep.subr.bf16.mxu0 %v966_v0  ;;  %790 = vmatpush3.bf16.msra.mxu1 %v787_v36 }
  0x51   : > { %792 = vmatprep.subr.bf16.mxu1 %v791_v42 }
  0x53   : > { %764 = vmatpush1.bf16.msra.mxu0 %v763_v39 }
  0x54   : > { %765 = vmatprep.subr.bf16.mxu0 %v966_v0  ;;  %794 = vmatpush3.bf16.msra.mxu1 %v791_v42 }
  0x55   : > { %796 = vmatprep.subr.bf16.mxu1 %v795_v48 }
  0x57   : > { %767 = vmatpush1.bf16.msra.mxu0 %v766_v45 }
  0x58   : > { %768 = vmatprep.subr.bf16.mxu0 %v966_v0  ;;  %798 = vmatpush3.bf16.msra.mxu1 %v795_v48  ;;  %v477_v0 = vld [vmem:[%s1275_s4 + $0x18] sm:$0xff] }
  0x59   : > { %800 = vmatprep.subr.bf16.mxu1 %v799_v55  ;;  %v807_v1 = vpack.c.bf16 %v477_v0, %v476_v63 }
  0x5b   : > { %770 = vmatpush1.bf16.msra.mxu0 %v769_v49 }
  0x5c   : > { %802 = vmatpush3.bf16.msra.mxu1 %v799_v55 }
  0x5d   : > { %804 = vmatprep.subr.bf16.mxu1 %v803_v58 }
  0x5e   : > { %364 = vmatmul.mubr.f32.vlgmr.msra.gmra.mrb[0].mxu0 %v288_v50 }
  0x5f   : > { %663 = vmatprep.mubr.msk.f32.mxu0 %vm292_vm0, %v291_v51 }
  0x62   : > { %369 = vmatmul.mubr.f32.gmra.mrb[2].mxu0 %v290_v52 }
 0x131   : > { %v365_v59 = vpop.f32.mrb[0].mxu0 }
 0x132   : > { %v367_v60 = vpop.f32.mrb[1].mxu0  ;;  %730 = vmatprep.mubr.f32.mxu1 %v365_v59 }
 0x135   : > { %v370_v61 = vpop.f32.mrb[2].mxu0 }
 0x136   : > { %v372_v62 = vpop.f32.mrb[3].mxu0  ;;  %731 = vmatmul.mubr.f32.vlgmr.msra.gmra.mrb[0].mxu1 %v370_v61 }
 0x137   : > { %806 = vmatpush3.bf16.msra.mxu1 %v803_v58 }
 0x138   : > { %808 = vmatprep.subr.bf16.mxu1 %v807_v1 }
 0x13b   : > { %810 = vmatpush3.bf16.msra.mxu1 %v807_v1 }
 0x209   : > { %v732_v3 = vpop.f32.mrb[0].mxu1 }
 0x20a   : > { %v469_v4 = vadd.f32 %v732_v3, %v664_v2  ;;  %v463_v5 = vpop.f32.mrb[1].mxu1 }
 0x20b   : > { %v464_v6 = vadd.f32 %v664_v2, %v463_v5 }
 0x20c   : > { %v473_v8 = vmax.f32 %v469_v4, 0.0 }
 0x20d   : > { %v472_v7 = vmax.f32 %v464_v6, 0.0 }
 0x20f   : > { %741 = vmatprep.mubr.msk.f32.mxu1 %vm485_vm1, %v472_v7 }
 0x210   : > { %742 = vmatmul.mubr.msk.f32.vlgmr.msra.gmra.mrb[2].mxu1 %vm485_vm1, %v473_v8 }
 0x2e3   : > { %v743_v10 = vpop.f32.mrb[2].mxu1 }
 0x2e4   : > { %v564_v11 = vadd.f32 %v743_v10, %v665_v9  ;;  %v558_v12 = vpop.f32.mrb[3].mxu1 }
 0x2e5   : > { %v559_v13 = vadd.f32 %v665_v9, %v558_v12 }
 0x2e6   : > { %568 = vst [vmem:[%s269_s26 + $0x8] sm:$0xff] %v564_v11 }
 0x2e7   : > { %567 = vst [vmem:[%s269_s26] sm:$0xff] %v559_v13 }
 0x2e8   : > { %908 = shalt.err (!%p905_p2)
}
 0x2e9   : > { %s909_s17 = scalar_lea.hbm %s1227_s19, 256  ;;  %s913_s11 = scalar_lea.hbm %s1277_s6, 512 }
 0x2ea   : > { %p910_p4 = scmp.ne.s32.totalorder %s1227_s19, %s909_s17  ;;  %p914_p9 = scmp.lt.u32.totalorder %s1227_s19, %s1277_s6 }
 0x2eb   : > { %p915_p1 = scmp.lt.u32.totalorder %s913_s11, %s909_s17  ;;  %p917_p6 = scmp.lt.u32.totalorder %s909_s17, %s1227_s19 }
 0x2ec   : > { %p911_p5 = pnand %p910_p4, %p1283_p11 }
 0x2ed   : > { %p916_p3 = por %p915_p1, %p914_p9 }
 0x2ee   : > { %p912_p7 = pneg %p911_p5 }
 0x2ef   : > { %p918_p12 = por %p917_p6, %p916_p3 }
 0x2f1   : > { %p919_p13 = pnand %p918_p12, %p912_p7 }
 0x2f3   : > { %922 = shalt.err (!%p919_p13)
}
 0x2f4   : > { %s968_s16 = smov 128   ;;  %s969_s18 = smov 8  }
 0x2f5   : > { %816 = dma.vmem_to_hbm [thread:$0]  (%p1283_p11), %s1222_s29, 256, %s1227_s19, %s570_s10, %s968_s16, %s968_s16, %s969_s18  }
 0x2f6 PF: > { %s598_s12 = sand.u32 1, %s949_s21   ;;  %p1284_p8 = scmp.ne.s32.totalorder %s1281_s9, 0 }
 0x2f7   : > { %p1285_p10 = scmp.ge.s32.totalorder %s961_s24, 2  ;;  %s599_s25 = scalar_lea.sflag [#allocation4], %s598_s12 }
 0x2f9   : > { %p823_p0 = pnand %p1285_p10, %p1284_p8 }
 0x2fb   : > { %944 = dma.done.wait (!%p823_p0), %s599_s25, 256  }
 0x2fc   : > { %946 = vsyncadd (!%p823_p0), %s599_s25, 4294967040  ;;  %p19_p2 = scmp.ge.s32.totalorder %s1030_s27, 4   ;;  %s1286_s21 = smov %s953_s22 }
 0x2fd   : > { %s1287_s22 = smov %s957_s23  ;;  %s1288_s23 = smov %s1042_s30 }
 0x2fe   : > { %s1289_s24 = smov %s1030_s27  ;;  %21 = sbr.rel (!%p19_p2) target bundleno = 5 (0x5), region = 89 }
 0x305   :  { %604 = vsyncpa [#allocation3], 1 }
 0x306   :  { %606 = vsyncpa [#allocation3 + $0x1], 1 }
 0x307   :  { %607 = vsyncpa [#allocation4], 1 }
 0x308   :  { %609 = vsyncpa [#allocation4 + $0x1], 1 }

</bundles_post_ra>
